<compile_context>
chip_gen: v6e
topology: v6e:2x2x1
jax: 0.10.0
libtpu: 0.0.40
codegen_flags: <defaults>
</compile_context>

<pallas_src>
import functools

import jax
import jax.numpy as jnp
from jax.experimental import pallas as pl
from jax.experimental.pallas import tpu as pltpu


def _round_up(x, m):
    return ((x + m - 1) // m) * m


def _qnet_kernel(x_ref, w1_ref, b1_ref, w2_ref, b2_ref, o_ref):
    # hidden = relu(x @ W1 + b1): bf16 MXU matmul, f32 accumulate + epilogue.
    h = jnp.dot(x_ref[...], w1_ref[...], preferred_element_type=jnp.float32)
    h = jnp.maximum(h + b1_ref[...], 0.0)          # b1 (1, Hp) broadcasts over batch
    # out = hidden @ W2 + b2 (cast activations to bf16 for the MXU, acc in f32).
    o = jnp.dot(h.astype(jnp.bfloat16), w2_ref[...],
                preferred_element_type=jnp.float32)
    o_ref[...] = (o + b2_ref[...]).astype(o_ref.dtype)


def prepare_params(w1, b1, w2, b2):
    """Pad feature dims to 128-lane multiples and cast matmul operands to bf16.

    Call ONCE (and again only after an optimizer step). Zero padding is exact:
    padded hidden columns stay 0 through ReLU because b1 is zero-padded too.
    Returns (padded_params, (in_features, hidden_size, output_size)).
    """
    I, H = w1.shape
    O = w2.shape[1]
    I_pad, H_pad, O_pad = _round_up(I, 128), _round_up(H, 128), _round_up(O, 128)
    w1_p = jnp.zeros((I_pad, H_pad), jnp.bfloat16).at[:I, :H].set(w1.astype(jnp.bfloat16))
    w2_p = jnp.zeros((H_pad, O_pad), jnp.bfloat16).at[:H, :O].set(w2.astype(jnp.bfloat16))
    b1_p = jnp.zeros((1, H_pad), jnp.float32).at[0, :H].set(b1.astype(jnp.float32))
    b2_p = jnp.zeros((1, O_pad), jnp.float32).at[0, :O].set(b2.astype(jnp.float32))
    return (w1_p, b1_p, w2_p, b2_p), (I, H, O)


def _choose_batch_tiling(B, block_batch):
    """TB multiple of 16 (bf16 sublane pack); >=2 tiles when possible (v7x has
    two TensorCores sharing the parallel axis); no whole dead tile."""
    B16 = _round_up(B, 16)
    if B16 >= 32:
        tb = min(block_batch, B16 // 2)
        tb = max(16, (tb // 16) * 16)
    else:
        tb = B16
    return tb, _round_up(B16, tb)


@functools.partial(jax.jit, static_argnames=("out_features", "block_batch"))
def linear_qnet_forward(x, w1_p, b1_p, w2_p, b2_p, *, out_features, block_batch=512):
    """x: (B, I) f32; padded params from prepare_params() -> (B, out_features) f32."""
    B, I = x.shape
    I_pad, H_pad = w1_p.shape
    O_pad = w2_p.shape[1]

    TB, B_pad = _choose_batch_tiling(B, block_batch)
    grid = (B_pad // TB,)

    # Only the per-call x pad/cast remains in the forward path; with
    # allow_input_fusion=[0] XLA may fuse it directly into the pallas_call
    # input stream instead of writing x_p to HBM first.
    x_p = jnp.zeros((B_pad, I_pad), jnp.bfloat16).at[:B, :I].set(x.astype(jnp.bfloat16))

    flops = 2 * B_pad * (I_pad * H_pad + H_pad * O_pad)
    bytes_accessed = (x_p.size * 2 + w1_p.size * 2 + w2_p.size * 2
                      + b1_p.size * 4 + b2_p.size * 4 + B_pad * O_pad * 4)

    out_padded = pl.pallas_call(
        _qnet_kernel,
        out_shape=jax.ShapeDtypeStruct((B_pad, O_pad), jnp.float32),
        grid_spec=pltpu.PrefetchScalarGridSpec(
            num_scalar_prefetch=0,
            grid=grid,
            in_specs=[
                pl.BlockSpec((TB, I_pad), lambda i: (i, 0)),      # x: batch-tiled
                pl.BlockSpec((I_pad, H_pad), lambda i: (0, 0)),   # W1: resident
                pl.BlockSpec((1, H_pad), lambda i: (0, 0)),       # b1: resident
                pl.BlockSpec((H_pad, O_pad), lambda i: (0, 0)),   # W2: resident
                pl.BlockSpec((1, O_pad), lambda i: (0, 0)),       # b2: resident
            ],
            out_specs=pl.BlockSpec((TB, O_pad), lambda i: (i, 0)),
        ),
        compiler_params=pltpu.CompilerParams(
            dimension_semantics=("parallel",),
            allow_input_fusion=[0],
        ),
        cost_estimate=pl.CostEstimate(
            flops=flops, transcendentals=0, bytes_accessed=bytes_accessed),
    )(x_p, w1_p, b1_p, w2_p, b2_p)

    # Un-pad (cheap, fused under the same jit).
    return out_padded[:B, :out_features]


def init_params(key, input_size, hidden_size, output_size):
    """Deterministic init mimicking nn.Linear (uniform(-1/sqrt(fan_in), 1/sqrt(fan_in)))."""
    k1, k2, k3, k4 = jax.random.split(key, 4)
    lim1 = 1.0 / jnp.sqrt(input_size)
    lim2 = 1.0 / jnp.sqrt(hidden_size)
    # Weights stored pre-transposed: (in_features, out_features).
    w1 = jax.random.uniform(k1, (input_size, hidden_size), jnp.float32, -lim1, lim1)
    b1 = jax.random.uniform(k2, (hidden_size,), jnp.float32, -lim1, lim1)
    w2 = jax.random.uniform(k3, (hidden_size, output_size), jnp.float32, -lim2, lim2)
    b2 = jax.random.uniform(k4, (output_size,), jnp.float32, -lim2, lim2)
    return w1, b1, w2, b2


if __name__ == "__main__":
    # Typical snake-game Q-net sizes: input=11, hidden=32, output=3.
    batch, input_size, hidden_size, output_size = 8, 11, 32, 3

    key = jax.random.PRNGKey(0)
    kx, kp = jax.random.split(key)
    x = jax.random.normal(kx, (batch, input_size), jnp.float32)
    w1, b1, w2, b2 = init_params(kp, input_size, hidden_size, output_size)

    # One-time pad/cast of the parameters (re-done only after optimizer steps).
    (w1_p, b1_p, w2_p, b2_p), (_, _, O) = prepare_params(w1, b1, w2, b2)

    out = linear_qnet_forward(x, w1_p, b1_p, w2_p, b2_p, out_features=O)
    out = jax.block_until_ready(out)

    # Reference in plain f32 JAX (same math as the PyTorch forward).
    ref = jnp.maximum(x @ w1 + b1, 0.0) @ w2 + b2
    assert out.shape == (batch, output_size)
    # bf16 matmul inputs -> loosened tolerance vs. the f32 reference.
    assert jnp.allclose(out, ref, atol=5e-2, rtol=5e-2), (
        f"max abs err {jnp.max(jnp.abs(out - ref))}")

    print("KERNEL_OK")
</pallas_src>

<mosaic_0001>
module attributes {stable_mosaic.version = 11 : i64} {
  func.func @_qnet_kernel(%arg0: i32, %arg1: memref<16x128xbf16, #tpu.memory_space<vmem>>, %arg2: memref<128x128xbf16, #tpu.memory_space<vmem>>, %arg3: memref<1x128xf32, #tpu.memory_space<vmem>>, %arg4: memref<128x128xbf16, #tpu.memory_space<vmem>>, %arg5: memref<1x128xf32, #tpu.memory_space<vmem>>, %arg6: memref<16x128xf32, #tpu.memory_space<vmem>>) attributes {dimension_semantics = [#tpu.dimension_semantics<parallel>], iteration_bounds = array<i64: 1>, scalar_prefetch = 0 : i64, scratch_operands = 0 : i64, tpu.core_type = #tpu.core_type<tc>, window_params = [{transform_indices = @transform_0, window_bounds = array<i64: 16, 128>}, {pipeline_mode = #tpu.pipeline_mode<synchronous>, transform_indices = @transform_1, window_bounds = array<i64: 128, 128>}, {pipeline_mode = #tpu.pipeline_mode<synchronous>, transform_indices = @transform_2, window_bounds = array<i64: 1, 128>}, {pipeline_mode = #tpu.pipeline_mode<synchronous>, transform_indices = @transform_3, window_bounds = array<i64: 128, 128>}, {pipeline_mode = #tpu.pipeline_mode<synchronous>, transform_indices = @transform_4, window_bounds = array<i64: 1, 128>}, {transform_indices = @transform_5, window_bounds = array<i64: 16, 128>}]} {
    %c0 = arith.constant 0 : index
    %c0_0 = arith.constant 0 : index
    %0 = vector.load %arg1[%c0, %c0_0] : memref<16x128xbf16, #tpu.memory_space<vmem>>, vector<16x128xbf16>
    %c0_1 = arith.constant 0 : index
    %c0_2 = arith.constant 0 : index
    %1 = vector.load %arg2[%c0_1, %c0_2] : memref<128x128xbf16, #tpu.memory_space<vmem>>, vector<128x128xbf16>
    %cst = arith.constant dense<0.000000e+00> : vector<16x128xf32>
    %2 = tpu.matmul %0, %1, %cst {dimension_numbers = #tpu.dot_dimension_numbers<[1], [0], [0], [1], [0, 0, 1, 1], [], []>} : vector<16x128xbf16>, vector<128x128xbf16>, vector<16x128xf32> -> vector<16x128xf32>
    %c0_3 = arith.constant 0 : index
    %c0_4 = arith.constant 0 : index
    %3 = vector.load %arg3[%c0_3, %c0_4] : memref<1x128xf32, #tpu.memory_space<vmem>>, vector<1x128xf32>
    %4 = vector.broadcast %3 : vector<1x128xf32> to vector<16x128xf32>
    %5 = arith.addf %2, %4 : vector<16x128xf32>
    %cst_5 = arith.constant 0.000000e+00 : f32
    %6 = vector.broadcast %cst_5 : f32 to vector<16x128xf32>
    %7 = arith.maximumf %5, %6 : vector<16x128xf32>
    %8 = arith.truncf %7 : vector<16x128xf32> to vector<16x128xbf16>
    %c0_6 = arith.constant 0 : index
    %c0_7 = arith.constant 0 : index
    %9 = vector.load %arg4[%c0_6, %c0_7] : memref<128x128xbf16, #tpu.memory_space<vmem>>, vector<128x128xbf16>
    %cst_8 = arith.constant dense<0.000000e+00> : vector<16x128xf32>
    %10 = tpu.matmul %8, %9, %cst_8 {dimension_numbers = #tpu.dot_dimension_numbers<[1], [0], [0], [1], [0, 0, 1, 1], [], []>} : vector<16x128xbf16>, vector<128x128xbf16>, vector<16x128xf32> -> vector<16x128xf32>
    %c0_9 = arith.constant 0 : index
    %c0_10 = arith.constant 0 : index
    %11 = vector.load %arg5[%c0_9, %c0_10] : memref<1x128xf32, #tpu.memory_space<vmem>>, vector<1x128xf32>
    %12 = vector.broadcast %11 : vector<1x128xf32> to vector<16x128xf32>
    %13 = arith.addf %10, %12 : vector<16x128xf32>
    %c0_11 = arith.constant 0 : index
    %c0_12 = arith.constant 0 : index
    %14 = vector.load %arg6[%c0_11, %c0_12] : memref<16x128xf32, #tpu.memory_space<vmem>>, vector<16x128xf32>
    tpu.vector_store %arg6[%c0_11, %c0_12], %13 {strides = array<i32>} : memref<16x128xf32, #tpu.memory_space<vmem>>, vector<16x128xf32>,
    return
  }
  func.func @transform_0(%arg0: i32) -> (i32, i32) {
    %c0_i32 = arith.constant 0 : i32
    %c0_i32_0 = arith.constant 0 : i32
    return %arg0, %c0_i32 : i32, i32
  }
  func.func @transform_1(%arg0: i32) -> (i32, i32) {
    %c0_i32 = arith.constant 0 : i32
    %c0_i32_0 = arith.constant 0 : i32
    %c0_i32_1 = arith.constant 0 : i32
    return %c0_i32, %c0_i32_0 : i32, i32
  }
  func.func @transform_2(%arg0: i32) -> (i32, i32) {
    %c0_i32 = arith.constant 0 : i32
    %c0_i32_0 = arith.constant 0 : i32
    %c0_i32_1 = arith.constant 0 : i32
    return %c0_i32, %c0_i32_0 : i32, i32
  }
  func.func @transform_3(%arg0: i32) -> (i32, i32) {
    %c0_i32 = arith.constant 0 : i32
    %c0_i32_0 = arith.constant 0 : i32
    %c0_i32_1 = arith.constant 0 : i32
    return %c0_i32, %c0_i32_0 : i32, i32
  }
  func.func @transform_4(%arg0: i32) -> (i32, i32) {
    %c0_i32 = arith.constant 0 : i32
    %c0_i32_0 = arith.constant 0 : i32
    %c0_i32_1 = arith.constant 0 : i32
    return %c0_i32, %c0_i32_0 : i32, i32
  }
  func.func @transform_5(%arg0: i32) -> (i32, i32) {
    %c0_i32 = arith.constant 0 : i32
    %c0_i32_0 = arith.constant 0 : i32
    return %arg0, %c0_i32 : i32, i32
  }
}

</mosaic_0001>

<bundles_post_ra>
// kernel: linear_qnet_forward.1
= control target key start
LH: loop header
LB: loop body
LE: loop exit
PB: predicated region body
PF: predicated region fallthrough
CT: control target
= control target key end

     0   :  { %10 = vsyncpa [#allocation3], 0  ;;  %s493_s0 = inlined_call_operand.vmem [shape: bf16[16,128], index: 0, kind: input, shape index: {}]   ;;  %s494_s1 = inlined_call_operand.hbm [shape: bf16[128,128], index: 1, kind: input, shape index: {}]   ;;  %s495_s2 = inlined_call_operand.vmem [shape: f32[1,128], index: 2, kind: input, shape index: {}]   ;;  %s496_s3 = inlined_call_operand.hbm [shape: bf16[128,128], index: 3, kind: input, shape index: {}]   ;;  %s497_s4 = inlined_call_operand.vmem [shape: f32[1,128], index: 4, kind: input, shape index: {}]   ;;  %s498_s5 = inlined_call_operand.vmem [shape: f32[16,128], index: 5, kind: output, shape index: {}]  }
   0x1   :  { %11 = vsyncpa [#allocation5], 0  ;;  %s436_s18 = smov [#allocation2]  }
   0x2   :  { %s19_s19 = sshll.u32 %s436_s18, 4  ;;  %s20_s19 = int_to_ptr.vmem [resolvable:$true] %s19_s19 }
   0x3   :  { %s400_s20 = scalar_lea.vmem %s20_s19, 1024  ;;  %p405_p1 = scmp.lt.s32.totalorder %s20_s19, %s20_s19 }
   0x4   :  { %p401_p0 = scmp.ne.s32.totalorder %s20_s19, %s400_s20  ;;  %p406_p2 = scmp.lt.s32.totalorder %s400_s20, %s400_s20 }
   0x6   :  { %p407_p3 = por %p406_p2, %p405_p1 }
   0x8   :  { %p408_p4 = pnand %p407_p3, %p401_p0 }
   0xa   :  { %411 = shalt.err (!%p408_p4)
}
   0xb   :  { %s437_s21 = smov 64   ;;  %s438_s22 = smov 4  }
   0xc   :  { %25 = dma.hbm_to_vmem [thread:$0]  %s494_s1, 1024, %s20_s19, [#allocation3], %s437_s21, %s437_s21, %s438_s22  }
   0xd   :  { %s439_s25 = smov [#allocation4]  }
   0xe   :  { %s33_s26 = sshll.u32 %s439_s25, 4  ;;  %s34_s26 = int_to_ptr.vmem [resolvable:$true] %s33_s26 }
   0xf   :  { %s420_s27 = scalar_lea.vmem %s34_s26, 1024  ;;  %p425_p6 = scmp.lt.s32.totalorder %s34_s26, %s34_s26 }
  0x10   :  { %p421_p5 = scmp.ne.s32.totalorder %s34_s26, %s420_s27  ;;  %p426_p7 = scmp.lt.s32.totalorder %s420_s27, %s420_s27 }
  0x12   :  { %p427_p8 = por %p426_p7, %p425_p6 }
  0x14   :  { %p428_p9 = pnand %p427_p8, %p421_p5 }
  0x16   :  { %431 = shalt.err (!%p428_p9)
}
  0x17   :  { %39 = dma.hbm_to_vmem [thread:$0]  %s496_s3, 1024, %s34_s26, [#allocation5], %s437_s21, %s437_s21, %s438_s22  }
  0x18   :  { %432 = dma.done.wait [#allocation3], 1024  }
  0x19   :  { %433 = vsyncadd [#allocation3], 4294966272 }
  0x1a   :  { %434 = dma.done.wait [#allocation5], 1024  }
  0x1b   :  { %435 = vsyncadd [#allocation5], 4294966272  ;;  %v440_v0 = vmov 0.0   ;;  %vm441_vm0 = vmmov 0   ;;  %v375_v1 = vld [vmem:[#allocation2 + $0x38] sm:$0xff]   ;;  %v376_v2 = vld [vmem:[#allocation2 + $0x30] sm:$0xff]  }
  0x1c   :  { %329 = vmatprep.subr.bf16.mxu0 %v440_v0  ;;  %345 = vmatprep.mubr.msk.bf16.mxu0 %vm441_vm0, %v440_v0  ;;  %v377_v3 = vld [vmem:[#allocation2 + $0x28] sm:$0xff]   ;;  %v384_v4 = vld [vmem:[#allocation4 + $0x38] sm:$0xff]   ;;  %v378_v5 = vld [vmem:[#allocation2 + $0x20] sm:$0xff]  }
  0x1d   :  { %349 = vmatprep.subr.bf16.mxu1 %v440_v0  ;;  %365 = vmatprep.mubr.msk.bf16.mxu1 %vm441_vm0, %v440_v0  ;;  %v385_v6 = vld [vmem:[#allocation4 + $0x30] sm:$0xff]   ;;  %v379_v7 = vld [vmem:[#allocation2 + $0x18] sm:$0xff]   ;;  %v386_v8 = vld [vmem:[#allocation4 + $0x28] sm:$0xff]  }
  0x1e   :  { %330 = vmatpush3.bf16.msra.mxu0 %v375_v1  ;;  %350 = vmatpush3.bf16.msra.mxu1 %v384_v4  ;;  %v380_v9 = vld [vmem:[#allocation2 + $0x10] sm:$0xff]   ;;  %v387_v10 = vld [vmem:[#allocation4 + $0x20] sm:$0xff]   ;;  %v381_v11 = vld [vmem:[#allocation2 + $0x8] sm:$0xff]  }
  0x1f   :  { %331 = vmatprep.subr.bf16.mxu0 %v440_v0  ;;  %351 = vmatprep.subr.bf16.mxu1 %v440_v0  ;;  %v388_v12 = vld [vmem:[#allocation4 + $0x18] sm:$0xff]   ;;  %v382_v13 = vld [vmem:[#allocation2] sm:$0xff]   ;;  %v389_v15 = vld [vmem:[#allocation4 + $0x10] sm:$0xff]  }
  0x20   :  { %v383_v14 = vld [vmem:[%s493_s0] sm:$0xff]   ;;  %v390_v16 = vld [vmem:[#allocation4 + $0x8] sm:$0xff]  }
  0x21   :  { %v391_v17 = vld [vmem:[#allocation4] sm:$0xff]  }
  0x22   :  { %332 = vmatpush3.bf16.msra.mxu0 %v376_v2  ;;  %352 = vmatpush3.bf16.msra.mxu1 %v385_v6  ;;  %v292_v18 = vld [vmem:[%s495_s2] ss:$0 sm:$0xff] }
  0x23   :  { %333 = vmatprep.subr.bf16.mxu0 %v440_v0  ;;  %353 = vmatprep.subr.bf16.mxu1 %v440_v0  ;;  %v302_v28 = vld [vmem:[%s497_s4] ss:$0 sm:$0xff] }
  0x26   :  { %334 = vmatpush3.bf16.msra.mxu0 %v377_v3  ;;  %354 = vmatpush3.bf16.msra.mxu1 %v386_v8 }
  0x27   :  { %335 = vmatprep.subr.bf16.mxu0 %v440_v0  ;;  %355 = vmatprep.subr.bf16.mxu1 %v440_v0 }
  0x2a   :  { %336 = vmatpush3.bf16.msra.mxu0 %v378_v5  ;;  %356 = vmatpush3.bf16.msra.mxu1 %v387_v10 }
  0x2b   :  { %337 = vmatprep.subr.bf16.mxu0 %v440_v0  ;;  %357 = vmatprep.subr.bf16.mxu1 %v440_v0 }
  0x2e   :  { %338 = vmatpush3.bf16.msra.mxu0 %v379_v7  ;;  %358 = vmatpush3.bf16.msra.mxu1 %v388_v12 }
  0x2f   :  { %339 = vmatprep.subr.bf16.mxu0 %v440_v0  ;;  %359 = vmatprep.subr.bf16.mxu1 %v440_v0 }
  0x32   :  { %340 = vmatpush3.bf16.msra.mxu0 %v380_v9  ;;  %360 = vmatpush3.bf16.msra.mxu1 %v389_v15 }
  0x33   :  { %341 = vmatprep.subr.bf16.mxu0 %v440_v0  ;;  %361 = vmatprep.subr.bf16.mxu1 %v440_v0 }
  0x36   :  { %342 = vmatpush3.bf16.msra.mxu0 %v381_v11  ;;  %362 = vmatpush3.bf16.msra.mxu1 %v390_v16 }
  0x37   :  { %343 = vmatprep.subr.bf16.mxu0 %v440_v0  ;;  %363 = vmatprep.subr.bf16.mxu1 %v440_v0 }
  0x3a   :  { %344 = vmatpush3.bf16.msra.mxu0 %v382_v13  ;;  %364 = vmatpush3.bf16.msra.mxu1 %v391_v17 }
  0x3d   :  { %346 = vmatmul.mubr.bf16.vlgmr.msra.gmra.mxu0 %v383_v14 }
  0xfd   :  { %v162_v19 = vpop.f32.mrf.mxu0 }
  0xfe   :  { %v163_v21 = vadd.f32 %v292_v18, %v162_v19 }
  0xff   :  { %v347_v20 = vpop.f32.mrf.mxu0 }
 0x100   :  { %v169_v25 = vmax.f32 %v163_v21, 0.0 }
 0x101   :  { %v165_v22 = vpop.f32.mrf.mxu0 }
 0x102   :  { %v166_v23 = vadd.f32 %v292_v18, %v165_v22 }
 0x103   :  { %v348_v24 = vpop.f32.mrf.mxu0 }
 0x104   :  { %v170_v26 = vmax.f32 %v166_v23, 0.0 }
 0x106   :  { %v171_v27 = vpack.c.bf16 %v170_v26, %v169_v25 }
 0x108   :  { %366 = vmatmul.mubr.bf16.vlgmr.msra.gmra.mxu1 %v171_v27 }
 0x1c8   :  { %v277_v29 = vpop.f32.mrf.mxu1 }
 0x1c9   :  { %v278_v30 = vadd.f32 %v302_v28, %v277_v29 }
 0x1ca   :  { %v367_v31 = vpop.f32.mrf.mxu1 }
 0x1cb   :  { %284 = vst [vmem:[%s498_s5] sm:$0xff] %v278_v30 }
 0x1cc   :  { %v280_v32 = vpop.f32.mrf.mxu1 }
 0x1cd   :  { %v281_v33 = vadd.f32 %v302_v28, %v280_v32 }
 0x1ce   :  { %v368_v34 = vpop.f32.mrf.mxu1 }
 0x1cf   :  { %285 = vst [vmem:[%s498_s5 + $0x8] sm:$0xff] %v281_v33 }
 0x1d0   :  { %290 = vsyncpa [#allocation3], 1 }
 0x1d1   :  { %291 = vsyncpa [#allocation5], 1 }

</bundles_post_ra>
